<compile_context>
chip_gen: v7x
topology: tpu7x:2x2x1
jax: 0.10.0
libtpu: 0.0.40
codegen_flags: <defaults>
</compile_context>

<pallas_src>
import jax
import jax.numpy as jnp
from jax.experimental import pallas as pl
from jax.experimental.pallas import tpu as pltpu


# ----------------------------------------------------------------------------
# Kernels
# ----------------------------------------------------------------------------
def _pfb_kernel_direct(x_ref, w_ref, out_ref):
    """Fused FIR+DFT matmul, contraction (K) un-tiled: one MXU dot per tile."""
    out_ref[...] = jnp.dot(
        x_ref[...], w_ref[...], preferred_element_type=jnp.float32
    )


def _pfb_kernel_acc(x_ref, w_ref, out_ref, acc_ref):
    """K-tiled variant: accumulate partial products in an f32 VMEM scratch."""
    @pl.when(pl.program_id(2) == 0)
    def _():
        acc_ref[...] = jnp.zeros_like(acc_ref)

    acc_ref[...] += jnp.dot(
        x_ref[...], w_ref[...], preferred_element_type=jnp.float32
    )

    @pl.when(pl.program_id(2) == pl.num_programs(2) - 1)
    def _():
        out_ref[...] = acc_ref[...]


# ----------------------------------------------------------------------------
# Host-side setup (done once)
# ----------------------------------------------------------------------------
def _round_up(x: int, m: int) -> int:
    return m * (-(-x // m))


def _vmem_capacity_bytes() -> int:
    """Physical VMEM of the local chip; conservative (v7x) fallback."""
    try:
        return int(pltpu.get_tpu_info().vmem_capacity_bytes)
    except Exception:
        return 64 * 1024 * 1024


def make_fir_weights(P: int, M: int) -> jnp.ndarray:
    """Deterministic windowed-sinc prototype filter, shape (M, P), f32."""
    N = M * P
    n = jnp.arange(N, dtype=jnp.float32)
    hamming = 0.54 - 0.46 * jnp.cos(2.0 * jnp.pi * n / (N - 1))
    proto = jnp.sinc((n - N / 2.0) / P) * hamming
    return proto.reshape(M, P).astype(jnp.float32)


def make_pfb_matrix(fir_weights: jnp.ndarray, P: int,
                    dtype=jnp.bfloat16) -> jnp.ndarray:
    """Fused FIR+DFT matrix W_c of shape (M*P, N_pad). Built once.

    W_c[m*P + p, k]      = fir[m, p] *  cos(2*pi*p*k/P)   for k in [0, P)
    W_c[m*P + p, P + k]  = fir[m, p] * -sin(2*pi*p*k/P)   for k in [0, P)
    Columns beyond 2P are zero padding up to a multiple of 128 lanes so the
    output stores are lane-dense (unmasked vst).
    """
    M, P_w = fir_weights.shape
    assert P_w == P
    # Exact integer reduction of n*k mod P before scaling keeps the angles
    # accurate at large P (valid while P*P < 2**31).
    n = jnp.arange(P, dtype=jnp.int32)
    nk = (n[:, None] * n[None, :]) % P
    ang = (2.0 * jnp.pi / P) * nk.astype(jnp.float32)
    dft = jnp.concatenate([jnp.cos(ang), -jnp.sin(ang)], axis=-1)      # (P, 2P)
    w_c = (fir_weights.astype(jnp.float32)[:, :, None]
           * dft[None, :, :]).reshape(M * P, 2 * P)
    # TODO(synk): for 2P << 128 benchmark an unpadded (B, 2P) output spec; the
    # zero columns cost HBM write bandwidth in this memory-bound kernel.
    n_pad = _round_up(2 * P, 128)
    if n_pad != 2 * P:
        w_c = jnp.pad(w_c, ((0, 0), (0, n_pad - 2 * P)))
    return w_c.astype(dtype)


# ----------------------------------------------------------------------------
# Forward pass
# ----------------------------------------------------------------------------
def pfb_forward(x: jnp.ndarray, w_c: jnp.ndarray, P: int,
                *, force_pallas: bool = False) -> jnp.ndarray:
    """x: (batch, M, P) f32, w_c: (M*P, N_pad) -> complex64 (batch, P)."""
    B, M, P_in = x.shape
    assert P_in == P
    K = M * P
    assert w_c.shape[0] == K
    N_pad = w_c.shape[1]
    in_dtype = w_c.dtype
    in_bytes = jnp.dtype(in_dtype).itemsize

    # Lane-dense 2-D layout; cast activations to the streaming dtype (bf16).
    x2d = x.reshape(B, K).astype(in_dtype)

    # Tiny-shape fast path: one sub-MXU tile -> pallas launch + pipeline fill
    # dominates; let XLA fuse the glue instead.
    if not force_pallas and 2 * B * K * N_pad < (1 << 22):
        out2d = jnp.dot(x2d, w_c, preferred_element_type=jnp.float32)
        return out2d[:, :P] + 1j * out2d[:, P:2 * P]

    # ---- generation-aware budgets -----------------------------------------
    vmem_cap = _vmem_capacity_bytes()
    vmem_limit = vmem_cap * 3 // 4          # ~48 MiB on v7x, ~96 MiB on v5e/v6e
    tile_budget = vmem_limit * 3 // 4       # headroom for compiler scratch

    # ---- batch tile: no host padding, >=2 parallel blocks when B is large --
    tb_cap = 512 if vmem_cap >= (100 << 20) else 256
    if B <= 8:
        TB = B                                  # full dim -> always legal
    elif B <= 2 * tb_cap:
        # Two+ batch blocks let v7x megacore shard the 'parallel' axis over
        # both TensorCores; negligible cost on single-core v5e/v6e.
        TB = min(tb_cap, _round_up(-(-B // 2), 8))
    else:
        TB = tb_cap

    def fits(tb, tk, tn, k_tiled):
        x_buf = 2 * tb * tk * in_bytes          # double-buffered
        w_buf = 2 * tk * tn * in_bytes
        o_buf = 2 * tb * tn * 4
        acc = tb * tn * 4 if k_tiled else 0
        return x_buf + w_buf + o_buf + acc <= tile_budget

    # Prefer W_c fully resident (TN = N_pad => DMA'd exactly once over the
    # whole grid); only shrink TN / tile K when VMEM forces it.
    TK, TN, k_tiled = K, N_pad, False
    while not fits(TB, TK, TN, k_tiled) and TN > 128:
        TN = max(128, _round_up(TN // 2, 128))
    if not fits(TB, TK, TN, k_tiled):
        # Tile the contraction axis with exact divisors only (ragged K blocks
        # would accumulate garbage into the f32 accumulator).
        divisors = [t for t in range(K - 128, 127, -128) if K % t == 0]
        for t in divisors:
            if fits(TB, t, TN, True):
                TK, k_tiled = t, True
                break
        else:
            if divisors:
                TK, k_tiled = divisors[-1], True
    while not fits(TB, TK, TN, k_tiled) and TB > 8:
        TB = max(8, _round_up(TB // 2, 8))

    nb = pl.cdiv(B, TB)
    nn = pl.cdiv(N_pad, TN)
    nk = pl.cdiv(K, TK)

    cost = pl.CostEstimate(
        flops=2 * B * K * N_pad,
        transcendentals=0,
        bytes_accessed=in_bytes * (B * K + K * N_pad) + 4 * B * N_pad,
    )

    if nk == 1:
        grid = (nb, nn)
        in_specs = [
            pl.BlockSpec((TB, K), lambda i, j: (i, 0)),    # x tile (resident over N)
            pl.BlockSpec((K, TN), lambda i, j: (0, j)),    # W_c panel
        ]
        out_specs = pl.BlockSpec((TB, TN), lambda i, j: (i, j))
        kernel = _pfb_kernel_direct
        scratch_shapes = ()
        dims = ("parallel", "parallel")
    else:
        grid = (nb, nn, nk)
        in_specs = [
            pl.BlockSpec((TB, TK), lambda i, j, k: (i, k)),
            pl.BlockSpec((TK, TN), lambda i, j, k: (k, j)),
        ]
        out_specs = pl.BlockSpec((TB, TN), lambda i, j, k: (i, j))
        kernel = _pfb_kernel_acc
        scratch_shapes = (pltpu.VMEM((TB, TN), jnp.float32),)
        dims = ("parallel", "parallel", "arbitrary")

    out2d = pl.pallas_call(
        kernel,
        out_shape=jax.ShapeDtypeStruct((B, N_pad), jnp.float32),
        grid=grid,
        in_specs=in_specs,
        out_specs=out_specs,
        scratch_shapes=scratch_shapes,
        compiler_params=pltpu.CompilerParams(
            dimension_semantics=dims,
            vmem_limit_bytes=int(vmem_limit),
        ),
        cost_estimate=cost,
    )(x2d, w_c)

    # Complex assembly (no native complex on the TPU vector units) is glue.
    return out2d[:, :P] + 1j * out2d[:, P:2 * P]


# ----------------------------------------------------------------------------
# Self-test
# ----------------------------------------------------------------------------
if __name__ == "__main__":
    # Small shapes consistent with the module: P channels, M taps, batch rows.
    P, M, batch_size = 16, 4, 8

    key = jax.random.PRNGKey(0)
    x = jax.random.normal(key, (batch_size, M, P), dtype=jnp.float32)
    fir_w = make_fir_weights(P, M)

    # Built once (streaming use reuses this across every forward call).
    w_c = make_pfb_matrix(fir_w, P)                    # bf16 fused FIR+DFT matrix

    out = pfb_forward(x, w_c, P, force_pallas=True)    # exercise the Pallas path
    out = jax.block_until_ready(out)
    assert out.shape == (batch_size, P)
    assert out.dtype == jnp.complex64

    # Check 1 (tight): identical bf16 operands through an XLA matmul ->
    # validates the kernel itself independent of input quantization.
    x2d = x.reshape(batch_size, M * P).astype(w_c.dtype)
    ref2d = jnp.dot(x2d, w_c, preferred_element_type=jnp.float32)
    ref_exact = ref2d[:, :P] + 1j * ref2d[:, P:2 * P]
    assert jnp.allclose(out.real, ref_exact.real, atol=1e-4, rtol=1e-4)
    assert jnp.allclose(out.imag, ref_exact.imag, atol=1e-4, rtol=1e-4)

    # Check 2 (semantic): FIR tap-sum then FFT, f32 reference. Norm-based
    # tolerance covers the bf16 quantization of x and W_c.
    fir_ref = jnp.sum(x * fir_w[None, :, :], axis=1)
    ref = jnp.fft.fft(fir_ref, axis=-1)
    rel_err = jnp.linalg.norm(out - ref) / jnp.linalg.norm(ref)
    assert float(rel_err) < 2e-2, float(rel_err)

    print("KERNEL_OK")
</pallas_src>

<mosaic_0001>
module attributes {stable_mosaic.version = 11 : i64} {
  func.func @_pfb_kernel_direct(%arg0: i32, %arg1: i32, %arg2: memref<8x64xbf16, #tpu.memory_space<vmem>>, %arg3: memref<64x128xbf16, #tpu.memory_space<vmem>>, %arg4: memref<8x128xf32, #tpu.memory_space<vmem>>) attributes {dimension_semantics = [#tpu.dimension_semantics<parallel>, #tpu.dimension_semantics<parallel>], iteration_bounds = array<i64: 1, 1>, scalar_prefetch = 0 : i64, scratch_operands = 0 : i64, tpu.core_type = #tpu.core_type<tc>, window_params = [{transform_indices = @transform_0, window_bounds = array<i64: 8, 64>}, {transform_indices = @transform_1, window_bounds = array<i64: 64, 128>}, {transform_indices = @transform_2, window_bounds = array<i64: 8, 128>}]} {
    %c0 = arith.constant 0 : index
    %c0_0 = arith.constant 0 : index
    %0 = vector.load %arg2[%c0, %c0_0] : memref<8x64xbf16, #tpu.memory_space<vmem>>, vector<8x64xbf16>
    %c0_1 = arith.constant 0 : index
    %c0_2 = arith.constant 0 : index
    %1 = vector.load %arg3[%c0_1, %c0_2] : memref<64x128xbf16, #tpu.memory_space<vmem>>, vector<64x128xbf16>
    %cst = arith.constant dense<0.000000e+00> : vector<8x128xf32>
    %2 = tpu.matmul %0, %1, %cst {dimension_numbers = #tpu.dot_dimension_numbers<[1], [0], [0], [1], [0, 0, 1, 1], [], []>} : vector<8x64xbf16>, vector<64x128xbf16>, vector<8x128xf32> -> vector<8x128xf32>
    %c0_3 = arith.constant 0 : index
    %c0_4 = arith.constant 0 : index
    %3 = vector.load %arg4[%c0_3, %c0_4] : memref<8x128xf32, #tpu.memory_space<vmem>>, vector<8x128xf32>
    tpu.vector_store %arg4[%c0_3, %c0_4], %2 {strides = array<i32>} : memref<8x128xf32, #tpu.memory_space<vmem>>, vector<8x128xf32>,
    return
  }
  func.func @transform_0(%arg0: i32, %arg1: i32) -> (i32, i32) {
    %c0_i32 = arith.constant 0 : i32
    %c0_i32_0 = arith.constant 0 : i32
    return %arg0, %c0_i32 : i32, i32
  }
  func.func @transform_1(%arg0: i32, %arg1: i32) -> (i32, i32) {
    %c0_i32 = arith.constant 0 : i32
    %c0_i32_0 = arith.constant 0 : i32
    return %c0_i32, %arg1 : i32, i32
  }
  func.func @transform_2(%arg0: i32, %arg1: i32) -> (i32, i32) {
    %c0_i32 = arith.constant 0 : i32
    return %arg0, %arg1 : i32, i32
  }
}

</mosaic_0001>

<bundles_post_ra>
// kernel: tpu_custom_call.1
= control target key start
LH: loop header
LB: loop body
LE: loop exit
PB: predicated region body
PF: predicated region fallthrough
CT: control target
= control target key end

     0   :  { %7 = vsyncpa [#allocation3], 0  ;;  %s303_s0 = inlined_call_operand.hbm [shape: bf16[8,64], index: 0, kind: input, shape index: {}]   ;;  %s304_s1 = inlined_call_operand.hbm [shape: bf16[64,128], index: 1, kind: input, shape index: {}]   ;;  %s305_s2 = inlined_call_operand.hbm [shape: f32[8,128], index: 2, kind: output, shape index: {}]  }
   0x1   :  { %8 = vsyncpa [#allocation6], 0 }
   0x2   :  { %9 = vsyncpa [#allocation4], 0  ;;  %s238_s9 = smov [#allocation2]   ;;  %s239_s11 = smov [#allocation5]  }
   0x3   :  { %s16_s10 = sshll.u32 %s238_s9, 4  ;;  %s25_s12 = sshll.u32 %s239_s11, 4  ;;  %s17_s10 = int_to_ptr.vmem [resolvable:$true] %s16_s10  ;;  %s260_s12 = int_to_ptr.vmem [resolvable:$true] %s25_s12 }
   0x4   :  { %s166_s15 = scalar_lea.hbm %s303_s0, 64 }
   0x5   :  { %p167_p0 = scmp.ne.s32.totalorder %s303_s0, %s166_s15  ;;  %p170_p1 = scmp.lt.u32.totalorder %s166_s15, %s303_s0 }
   0x7   :  { %p172_p2 = pnand %p170_p1, %p167_p0 }
   0x9   :  { %175 = shalt.err (!%p172_p2)
}
   0xa   :  { %s176_s20 = scalar_lea.vmem %s17_s10, 64  ;;  %p181_p4 = scmp.lt.s32.totalorder %s17_s10, %s17_s10 }
   0xb   :  { %p177_p3 = scmp.ne.s32.totalorder %s17_s10, %s176_s20  ;;  %p182_p5 = scmp.lt.s32.totalorder %s176_s20, %s176_s20 }
   0xd   :  { %p183_p6 = por %p182_p5, %p181_p4 }
   0xf   :  { %p184_p7 = pnand %p183_p6, %p177_p3 }
  0x11   :  { %187 = shalt.err (!%p184_p7)
}
  0x12   :  { %19 = dma.hbm_to_vmem [thread:$0]  %s303_s0, 64, %s17_s10, [#allocation3]  }
  0x13   :  { %s188_s25 = scalar_lea.hbm %s304_s1, 512 }
  0x14   :  { %p189_p8 = scmp.ne.s32.totalorder %s304_s1, %s188_s25  ;;  %p192_p9 = scmp.lt.u32.totalorder %s188_s25, %s304_s1 }
  0x16   :  { %p194_p10 = pnand %p192_p9, %p189_p8 }
  0x18   :  { %197 = shalt.err (!%p194_p10)
}
  0x19   :  { %s198_s30 = scalar_lea.vmem %s260_s12, 512  ;;  %p203_p12 = scmp.lt.s32.totalorder %s260_s12, %s260_s12 }
  0x1a   :  { %p199_p11 = scmp.ne.s32.totalorder %s260_s12, %s198_s30  ;;  %p204_p13 = scmp.lt.s32.totalorder %s198_s30, %s198_s30 }
  0x1c   :  { %p205_p0 = por %p204_p13, %p203_p12 }
  0x1e   :  { %p206_p1 = pnand %p205_p0, %p199_p11 }
  0x20   :  { %209 = shalt.err (!%p206_p1)
}
  0x21   :  { %s240_s0 = smov 64   ;;  %s241_s3 = smov 4  }
  0x22   :  { %31 = dma.hbm_to_vmem [thread:$0]  %s304_s1, 512, %s260_s12, [#allocation6], %s240_s0, %s240_s0, %s241_s3  }
  0x23   :  { %232 = dma.done.wait [#allocation3], 64  }
  0x24   :  { %233 = vsyncadd [#allocation3], 4294967232 }
  0x25   :  { %234 = dma.done.wait [#allocation6], 512  }
  0x26   :  { %235 = vsyncadd [#allocation6], 4294966784  ;;  %v242_v0 = vmov 0.0   ;;  %vm243_vm0 = vmmov 0   ;;  %v162_v1 = vld [vmem:[#allocation5] sm:$0xff]   ;;  %v163_v2 = vld [vmem:[#allocation5 + $0x8] sm:$0xff]  }
  0x27   :  { %143 = vmatprep.subr.bf16.mxu0 %v242_v0  ;;  %151 = vmatprep.mubr.msk.bf16.mxu0 %vm243_vm0, %v242_v0  ;;  %v164_v3 = vld [vmem:[#allocation5 + $0x10] sm:$0xff]   ;;  %v165_v4 = vld [vmem:[#allocation5 + $0x18] sm:$0xff]   ;;  %vm72_vm1 = vcmask 523264   ;;  %s244_s1 = smov [#allocation7]  }
  0x28   :  { %144 = vmatpush3.bf16.msra.mxu0 %v162_v1  ;;  %v39_v5 = vld [vmem:[#allocation2] sm:$0xf]  ;;  %s123_s6 = sshll.u32 %s244_s1, 4  ;;  %s124_s6 = int_to_ptr.vmem [resolvable:$true] %s123_s6 }
  0x29   :  { %145 = vmatprep.subr.bf16.mxu0 %v242_v0  ;;  %s210_s7 = scalar_lea.vmem %s124_s6, 128  ;;  %p215_p3 = scmp.lt.s32.totalorder %s124_s6, %s124_s6 }
  0x2a   :  { %p211_p2 = scmp.ne.s32.totalorder %s124_s6, %s210_s7  ;;  %p216_p4 = scmp.lt.s32.totalorder %s210_s7, %s210_s7 }
  0x2c   :  { %146 = vmatpush3.bf16.msra.mxu0 %v163_v2  ;;  %p217_p5 = por %p216_p4, %p215_p3 }
  0x2d   :  { %147 = vmatprep.subr.bf16.mxu0 %v242_v0 }
  0x2e   :  { %p218_p6 = pnand %p217_p5, %p211_p2 }
  0x30   :  { %148 = vmatpush3.bf16.msra.mxu0 %v164_v3 }
  0x31   :  { %149 = vmatprep.subr.bf16.mxu0 %v242_v0 }
  0x34   :  { %150 = vmatpush3.bf16.msra.mxu0 %v165_v4 }
  0x37   :  { %152 = vmatmul.mubr.msk.bf16.vlgmr.msra.gmra.mrb[0].mxu0 %vm72_vm1, %v39_v5 }
 0x10a   :  { %v110_v6 = vpop.f32.mrb[0].mxu0 }
 0x10b   :  { %116 = vst [vmem:[#allocation7] sm:$0xff] %v110_v6  ;;  %v153_v7 = vpop.f32.mrb[1].mxu0 }
 0x10c   :  { %v113_v8 = vpop.f32.mrb[2].mxu0 }
 0x10d   :  { %221 = shalt.err (!%p218_p6)
}
 0x10e   :  { %s222_s10 = scalar_lea.hbm %s305_s2, 128 }
 0x10f   :  { %p223_p7 = scmp.ne.s32.totalorder %s305_s2, %s222_s10  ;;  %p226_p8 = scmp.lt.u32.totalorder %s222_s10, %s305_s2 }
 0x111   :  { %p228_p9 = pnand %p226_p8, %p223_p7 }
 0x113   :  { %231 = shalt.err (!%p228_p9)
}
 0x114   :  { %126 = dma.vmem_to_hbm [thread:$0]  %s124_s6, 128, %s305_s2, [#allocation4]   ;;  %v154_v9 = vpop.f32.mrb[3].mxu0 }
 0x115   :  { %236 = dma.done.wait [#allocation4], 128  }
 0x116   :  { %237 = vsyncadd [#allocation4], 4294967168 }
 0x117   :  { %130 = vsyncpa [#allocation3], 1 }
 0x118   :  { %131 = vsyncpa [#allocation6], 1 }
 0x119   :  { %132 = vsyncpa [#allocation4], 1 }

</bundles_post_ra>
